<compile_context>
chip_gen: v7x
topology: tpu7x:2x2x1
jax: 0.10.0
libtpu: 0.0.40
codegen_flags: <defaults>
</compile_context>

<pallas_src>
import functools

import jax
import jax.numpy as jnp
from jax.experimental import pallas as pl
from jax.experimental.pallas import tpu as pltpu


def conv3x3_relu_kernel(xp_ref, w_ref, b_ref, o_ref):
    # xp_ref: (1, H+2, (W+2)*Cin)  padded, width-flattened image (this batch elem)
    # w_ref : (KH, (W+2)*Cin, W*Cout)  width-Toeplitz packed conv weights
    # b_ref : (1, W*Cout)              bias tiled across W (lane-dense)
    # o_ref : (H, W*Cout)              lane-dense output slab for this image
    H = o_ref.shape[0]
    KH = w_ref.shape[0]

    x_full = xp_ref[0]                      # (H+2, (W+2)*Cin), single VMEM load
    acc = jnp.zeros(o_ref.shape, jnp.float32)
    for kh in range(KH):                    # static unrolled loop over row taps
        xs = x_full[kh:kh + H, :]           # (H, (W+2)*Cin)
        acc += jnp.dot(xs, w_ref[kh], preferred_element_type=jnp.float32)
    acc = acc + b_ref[...]
    o_ref[...] = jnp.maximum(acc, 0.0).astype(o_ref.dtype)


def pack_conv3x3_weights(w, b, W, pad=1):
    """Pack PyTorch-layout conv weights into a width-Toeplitz matrix.

    w: (Cout, Cin, KH, KW) OIHW;  b: (Cout,)
    Returns:
      w_toep  : (KH, (W+2*pad)*Cin, W*Cout) with
                w_toep[kh, wp*Cin+cin, w*Cout+cout] = w[cout, cin, kh, wp-w]
                (zero when wp-w is outside [0, KW))
      bias_row: (1, W*Cout)
    """
    Cout, Cin, KH, KW = w.shape
    Wp = W + 2 * pad
    wgt = jnp.transpose(w, (2, 3, 1, 0))                    # (KH, KW, Cin, Cout)
    wp_i = jnp.arange(Wp)[:, None, None]
    w_i = jnp.arange(W)[None, :, None]
    kw_i = jnp.arange(KW)[None, None, :]
    sel = (wp_i == w_i + kw_i).astype(w.dtype)              # (Wp, W, KW)
    w_toep = jnp.einsum('pwk,hkio->hpiwo', sel, wgt)        # (KH, Wp, Cin, W, Cout)
    w_toep = w_toep.reshape(KH, Wp * Cin, W * Cout)
    bias_row = jnp.tile(b, W).reshape(1, W * Cout)
    return w_toep, bias_row


@functools.partial(jax.jit, static_argnames=('pad',))
def conv3x3_relu_pallas(x_nchw, w_toep, bias_row, pad=1):
    """Conv2d(3x3, stride=1, pad=1) + ReLU; hot path runs in a Pallas kernel."""
    N, Cin, H, W = x_nchw.shape
    KH = w_toep.shape[0]
    WCout = w_toep.shape[2]
    Cout = WCout // W
    Hp = H + 2 * pad
    WpCin = (W + 2 * pad) * Cin

    # NCHW -> NHWC, zero-pad H/W, flatten (W+2p, Cin) into the lane axis.
    # All fused by XLA under this jit (tiny layout prologue).
    x = jnp.transpose(x_nchw, (0, 2, 3, 1))
    xp = jnp.pad(x, ((0, 0), (pad, pad), (pad, pad), (0, 0)))
    xp = xp.reshape(N, Hp, WpCin)

    out2d = pl.pallas_call(
        conv3x3_relu_kernel,
        out_shape=jax.ShapeDtypeStruct((N * H, WCout), x_nchw.dtype),
        grid_spec=pltpu.PrefetchScalarGridSpec(
            num_scalar_prefetch=0,
            grid=(N,),  # 2 parallel steps -> feeds both v7x TensorCores
            in_specs=[
                pl.BlockSpec((1, Hp, WpCin), lambda n: (n, 0, 0)),   # one image
                pl.BlockSpec((KH, WpCin, WCout), lambda n: (0, 0, 0)),  # weights (resident)
                pl.BlockSpec((1, WCout), lambda n: (0, 0)),          # bias (resident)
            ],
            out_specs=pl.BlockSpec((H, WCout), lambda n: (n, 0)),    # lane-dense slab
        ),
        compiler_params=pltpu.CompilerParams(
            dimension_semantics=("parallel",)),
    )(xp, w_toep, bias_row)

    # (N*H, W*Cout) -> (N, H, W, Cout) -> NCHW, fused by XLA under this jit.
    return jnp.transpose(out2d.reshape(N, H, W, Cout), (0, 3, 1, 2))


class Backbone:
    """Synthetic deterministic backbone (conv3x3 + ReLU), returns tuple of features."""

    def __init__(self, cin, cout, key):
        kw_key, kb_key = jax.random.split(key)
        fan_in = cin * 3 * 3
        self.w = (jax.random.normal(kw_key, (cout, cin, 3, 3), jnp.float32)
                  * (2.0 / fan_in) ** 0.5)
        self.b = jax.random.normal(kb_key, (cout,), jnp.float32) * 0.01
        self._packed = {}  # Toeplitz-packed weights, keyed by spatial width W

    def _packed_for(self, W):
        if W not in self._packed:
            self._packed[W] = pack_conv3x3_weights(self.w, self.b, W)
        return self._packed[W]

    def __call__(self, x):
        W = x.shape[-1]
        w_toep, bias_row = self._packed_for(W)
        feat = conv3x3_relu_pallas(x, w_toep, bias_row)
        return (feat,)


class BaseModel:
    """Mirrors the PyTorch BaseModel: forward(x) -> backbone(x['image'])[0]."""

    def __init__(self, cfg=None, phase='train'):
        self.cfg = cfg
        self.phase = phase
        # TODO(synk): build_backbone(cfg) is config-registry driven in PyTorch;
        # synthesized here as a deterministic conv3x3+ReLU stem.
        self.backbone = Backbone(cin=4, cout=8, key=jax.random.PRNGKey(42))

    def forward(self, x):
        return self.backbone(x['image'])[0]


if __name__ == "__main__":
    key = jax.random.PRNGKey(0)
    image = jax.random.normal(key, (2, 4, 16, 16), jnp.float32)  # NCHW

    model = BaseModel(cfg=None, phase='eval')
    out = model.forward({'image': image})
    out = jax.block_until_ready(out)
    assert out.shape == (2, 8, 16, 16), out.shape

    # Reference check against XLA conv (same semantics as PyTorch Conv2d pad=1)
    ref = jax.lax.conv_general_dilated(
        image, model.backbone.w, window_strides=(1, 1), padding=((1, 1), (1, 1)),
        dimension_numbers=('NCHW', 'OIHW', 'NCHW'))
    ref = jnp.maximum(ref + model.backbone.b[None, :, None, None], 0.0)
    assert jnp.allclose(out, ref, atol=1e-4, rtol=1e-4), "mismatch vs reference"

    print("KERNEL_OK")
</pallas_src>

<mosaic_0001>
module attributes {stable_mosaic.version = 11 : i64} {
  func.func @conv3x3_relu_kernel(%arg0: i32, %arg1: memref<1x18x72xf32, #tpu.memory_space<vmem>>, %arg2: memref<3x72x128xf32, #tpu.memory_space<vmem>>, %arg3: memref<1x128xf32, #tpu.memory_space<vmem>>, %arg4: memref<16x128xf32, #tpu.memory_space<vmem>>) attributes {dimension_semantics = [#tpu.dimension_semantics<parallel>], iteration_bounds = array<i64: 2>, scalar_prefetch = 0 : i64, scratch_operands = 0 : i64, tpu.core_type = #tpu.core_type<tc>, window_params = [{transform_indices = @transform_0, window_bounds = array<i64: 1, 18, 72>}, {pipeline_mode = #tpu.pipeline_mode<synchronous>, transform_indices = @transform_1, window_bounds = array<i64: 3, 72, 128>}, {pipeline_mode = #tpu.pipeline_mode<synchronous>, transform_indices = @transform_2, window_bounds = array<i64: 1, 128>}, {transform_indices = @transform_3, window_bounds = array<i64: 16, 128>}]} {
    %c0 = arith.constant 0 : index
    %c0_0 = arith.constant 0 : index
    %c0_1 = arith.constant 0 : index
    %0 = vector.load %arg1[%c0, %c0_0, %c0_1] : memref<1x18x72xf32, #tpu.memory_space<vmem>>, vector<1x18x72xf32>
    %1 = vector.shape_cast %0 : vector<1x18x72xf32> to vector<18x72xf32>
    %cst = arith.constant 0.000000e+00 : f32
    %2 = vector.broadcast %cst : f32 to vector<16x128xf32>
    %3 = vector.extract_strided_slice %1 {offsets = [0, 0], sizes = [16, 72], strides = [1, 1]} : vector<18x72xf32> to vector<16x72xf32>
    %c0_2 = arith.constant 0 : index
    %c0_3 = arith.constant 0 : index
    %c0_4 = arith.constant 0 : index
    %4 = vector.load %arg2[%c0_2, %c0_3, %c0_4] : memref<3x72x128xf32, #tpu.memory_space<vmem>>, vector<1x72x128xf32>
    %5 = vector.shape_cast %4 : vector<1x72x128xf32> to vector<72x128xf32>
    %cst_5 = arith.constant dense<0.000000e+00> : vector<16x128xf32>
    %6 = tpu.matmul %3, %5, %cst_5 {dimension_numbers = #tpu.dot_dimension_numbers<[1], [0], [0], [1], [0, 0, 1, 1], [], []>} : vector<16x72xf32>, vector<72x128xf32>, vector<16x128xf32> -> vector<16x128xf32>
    %7 = arith.addf %2, %6 : vector<16x128xf32>
    %8 = vector.extract_strided_slice %1 {offsets = [1, 0], sizes = [16, 72], strides = [1, 1]} : vector<18x72xf32> to vector<16x72xf32>
    %c1 = arith.constant 1 : index
    %c0_6 = arith.constant 0 : index
    %c0_7 = arith.constant 0 : index
    %9 = vector.load %arg2[%c1, %c0_6, %c0_7] : memref<3x72x128xf32, #tpu.memory_space<vmem>>, vector<1x72x128xf32>
    %10 = vector.shape_cast %9 : vector<1x72x128xf32> to vector<72x128xf32>
    %cst_8 = arith.constant dense<0.000000e+00> : vector<16x128xf32>
    %11 = tpu.matmul %8, %10, %cst_8 {dimension_numbers = #tpu.dot_dimension_numbers<[1], [0], [0], [1], [0, 0, 1, 1], [], []>} : vector<16x72xf32>, vector<72x128xf32>, vector<16x128xf32> -> vector<16x128xf32>
    %12 = arith.addf %7, %11 : vector<16x128xf32>
    %13 = vector.extract_strided_slice %1 {offsets = [2, 0], sizes = [16, 72], strides = [1, 1]} : vector<18x72xf32> to vector<16x72xf32>
    %c2 = arith.constant 2 : index
    %c0_9 = arith.constant 0 : index
    %c0_10 = arith.constant 0 : index
    %14 = vector.load %arg2[%c2, %c0_9, %c0_10] : memref<3x72x128xf32, #tpu.memory_space<vmem>>, vector<1x72x128xf32>
    %15 = vector.shape_cast %14 : vector<1x72x128xf32> to vector<72x128xf32>
    %cst_11 = arith.constant dense<0.000000e+00> : vector<16x128xf32>
    %16 = tpu.matmul %13, %15, %cst_11 {dimension_numbers = #tpu.dot_dimension_numbers<[1], [0], [0], [1], [0, 0, 1, 1], [], []>} : vector<16x72xf32>, vector<72x128xf32>, vector<16x128xf32> -> vector<16x128xf32>
    %17 = arith.addf %12, %16 : vector<16x128xf32>
    %c0_12 = arith.constant 0 : index
    %c0_13 = arith.constant 0 : index
    %18 = vector.load %arg3[%c0_12, %c0_13] : memref<1x128xf32, #tpu.memory_space<vmem>>, vector<1x128xf32>
    %19 = vector.broadcast %18 : vector<1x128xf32> to vector<16x128xf32>
    %20 = arith.addf %17, %19 : vector<16x128xf32>
    %cst_14 = arith.constant 0.000000e+00 : f32
    %21 = vector.broadcast %cst_14 : f32 to vector<16x128xf32>
    %22 = arith.maximumf %20, %21 : vector<16x128xf32>
    %c0_15 = arith.constant 0 : index
    %c0_16 = arith.constant 0 : index
    %23 = vector.load %arg4[%c0_15, %c0_16] : memref<16x128xf32, #tpu.memory_space<vmem>>, vector<16x128xf32>
    tpu.vector_store %arg4[%c0_15, %c0_16], %22 {strides = array<i32>} : memref<16x128xf32, #tpu.memory_space<vmem>>, vector<16x128xf32>,
    return
  }
  func.func @transform_0(%arg0: i32) -> (i32, i32, i32) {
    %c0_i32 = arith.constant 0 : i32
    %c0_i32_0 = arith.constant 0 : i32
    %c0_i32_1 = arith.constant 0 : i32
    return %arg0, %c0_i32, %c0_i32_0 : i32, i32, i32
  }
  func.func @transform_1(%arg0: i32) -> (i32, i32, i32) {
    %c0_i32 = arith.constant 0 : i32
    %c0_i32_0 = arith.constant 0 : i32
    %c0_i32_1 = arith.constant 0 : i32
    %c0_i32_2 = arith.constant 0 : i32
    return %c0_i32, %c0_i32_0, %c0_i32_1 : i32, i32, i32
  }
  func.func @transform_2(%arg0: i32) -> (i32, i32) {
    %c0_i32 = arith.constant 0 : i32
    %c0_i32_0 = arith.constant 0 : i32
    %c0_i32_1 = arith.constant 0 : i32
    return %c0_i32, %c0_i32_0 : i32, i32
  }
  func.func @transform_3(%arg0: i32) -> (i32, i32) {
    %c0_i32 = arith.constant 0 : i32
    %c0_i32_0 = arith.constant 0 : i32
    return %arg0, %c0_i32 : i32, i32
  }
}

</mosaic_0001>

<bundles_post_ra>
// kernel: conv3x3_relu_pallas.1
= control target key start
LH: loop header
LB: loop body
LE: loop exit
PB: predicated region body
PF: predicated region fallthrough
CT: control target
= control target key end

     0   :  { %s748_s12 = smov 0   ;;  %s864_s0 = inlined_call_operand.vmem [shape: f32[2,18,72], index: 0, kind: input, shape index: {}]   ;;  %s865_s1 = inlined_call_operand.vmem [shape: f32[3,72,128], index: 1, kind: input, shape index: {}]   ;;  %s866_s2 = inlined_call_operand.vmem [shape: f32[1,128], index: 2, kind: input, shape index: {}]   ;;  %s867_s3 = inlined_call_operand.vmem [shape: f32[32,128], index: 3, kind: output, shape index: {}]  }
   0x1 LB: > { %s754_s13 = sadd.s32 4294967295, %s726_s12   ;;  %p532_p0 = scmp.ge.s32.totalorder %s726_s12, 1  ;;  %s726_s12 = sphi %s748_s12, %s13_s12  }
   0x2   : > { %p137_p1 = scmp.lt.s32.totalorder %s726_s12, 3 }
   0x4   : > { %p138_p2 = pnand %p532_p0, %p137_p1 }
   0x5   : > { %v175_v0 = vld [vmem:[%s865_s1] sm:$0xff] (!%p138_p2)  ;;  %v176_v1 = vld [vmem:[%s865_s1 + $0x8] sm:$0xff] (!%p138_p2)  ;;  %v177_v2 = vld [vmem:[%s865_s1 + $0x10] sm:$0xff] (!%p138_p2)  ;;  %p161_p3 = scmp.lt.s32.totalorder (!%p138_p2), %s754_s13, 1  ;;  %vm203_vm0 = vcmask (!%p138_p2), 588800   ;;  %vm197_vm1 = vcmask (!%p138_p2), 1046528  }
   0x6   : > { %141 = sbr.rel (%p138_p2) target bundleno = 264 (0x108), region = 32  ;;  %v675_v3 = vpack.c.bf16 (!%p138_p2), %v176_v1, %v175_v0  ;;  %v178_v4 = vld [vmem:[%s865_s1 + $0x18] sm:$0xff] (!%p138_p2)  ;;  %v179_v6 = vld [vmem:[%s865_s1 + $0x20] sm:$0xff] (!%p138_p2)  ;;  %v180_v7 = vld [vmem:[%s865_s1 + $0x28] sm:$0xff] (!%p138_p2)  ;;  %vm372_vm2 = vcmask (!%p138_p2), 1045504   ;;  %s534_s23 = sshll.u32 (!%p138_p2), %s754_s13, 1 }
   0x7   : > { %v679_v5 = vpack.c.bf16 (!%p138_p2), %v178_v4, %v177_v2  ;;  %v536_v8 = vld [vmem:[%s865_s1 + $0x48] sm:$0xff] (!%p138_p2)  ;;  %v537_v9 = vld [vmem:[%s865_s1 + $0x50] sm:$0xff] (!%p138_p2)  ;;  %v538_v11 = vld [vmem:[%s865_s1 + $0x58] sm:$0xff] (!%p138_p2)  ;;  %v683_v13 = vpack.c.bf16 (!%p138_p2), %v180_v7, %v179_v6  ;;  %p167_p4 = scmp.lt.s32.totalorder (!%p138_p2), %s534_s23, 3 }
   0x8   : > { %676 = vmatprep.subr.bf16.mxu0 (!%p138_p2), %v675_v3  ;;  %v659_v10 = vpack.c.bf16 (!%p138_p2), %v537_v9, %v536_v8  ;;  %v539_v12 = vld [vmem:[%s865_s1 + $0x60] sm:$0xff] (!%p138_p2)  ;;  %v540_v15 = vld [vmem:[%s865_s1 + $0x68] sm:$0xff] (!%p138_p2)  ;;  %v181_v16 = vld [vmem:[%s865_s1 + $0x30] sm:$0xff] (!%p138_p2) }
   0x9   : > { %678 = vmatpush3.bf16.msra.mxu0 (!%p138_p2), %v675_v3  ;;  %v663_v14 = vpack.c.bf16 (!%p138_p2), %v539_v12, %v538_v11  ;;  %v182_v17 = vld [vmem:[%s865_s1 + $0x38] sm:$0xff] (!%p138_p2)  ;;  %v541_v18 = vld [vmem:[%s865_s1 + $0x70] sm:$0xff] (!%p138_p2)  ;;  %v543_v25 = vld [vmem:[%s865_s1 + $0x80] sm:$0xff] (!%p138_p2) }
   0xa   : > { %680 = vmatprep.subr.bf16.mxu0 (!%p138_p2), %v679_v5  ;;  %660 = vmatprep.subr.bf16.mxu1 (!%p138_p2), %v659_v10  ;;  %v667_v22 = vpack.c.bf16 (!%p138_p2), %v541_v18, %v540_v15  ;;  %v687_v23 = vpack.c.bf16 (!%p138_p2), %v182_v17, %v181_v16  ;;  %v542_v24 = vld [vmem:[%s865_s1 + $0x78] sm:$0xff] (!%p138_p2)  ;;  %v183_v29 = vld [vmem:[%s865_s1 + $0x40] sm:$0xff] (!%p138_p2)  ;;  %v549_v31 = vld [vmem:[%s865_s1 + $0x90] sm:$0xff] (!%p138_p2) }
   0xb   : > { %662 = vmatpush3.bf16.msra.mxu1 (!%p138_p2), %v659_v10  ;;  %v671_v28 = vpack.c.bf16 (!%p138_p2), %v543_v25, %v542_v24  ;;  %v550_v32 = vld [vmem:[%s865_s1 + $0x98] sm:$0xff] (!%p138_p2)  ;;  %v551_v35 = vld [vmem:[%s865_s1 + $0xa0] sm:$0xff] (!%p138_p2)  ;;  %v552_v36 = vld [vmem:[%s865_s1 + $0xa8] sm:$0xff] (!%p138_p2) }
   0xc   : > { %664 = vmatprep.subr.bf16.mxu1 (!%p138_p2), %v663_v14  ;;  %v691_v38 = vpack.c.bf16 (!%p138_p2), %v550_v32, %v549_v31  ;;  %v544_v39 = vld [vmem:[%s865_s1 + $0x88] sm:$0xff] (!%p138_p2)  ;;  %v695_v40 = vpack.c.bf16 (!%p138_p2), %v552_v36, %v551_v35  ;;  %v553_v42 = vld [vmem:[%s865_s1 + $0xb0] sm:$0xff] (!%p138_p2)  ;;  %v554_v43 = vld [vmem:[%s865_s1 + $0xb8] sm:$0xff] (!%p138_p2) }
   0xd   : > { %s162_s26 = scalar_select %p161_p3, %s754_s13, 1  ;;  %682 = vmatpush3.bf16.msra.mxu0 %v679_v5  ;;  %v699_v45 = vpack.c.bf16 %v554_v43, %v553_v42  ;;  %v555_v46 = vld [vmem:[%s865_s1 + $0xc0] sm:$0xff]  ;;  %v556_v47 = vld [vmem:[%s865_s1 + $0xc8] sm:$0xff]  ;;  %v557_v50 = vld [vmem:[%s865_s1 + $0xd0] sm:$0xff] }
   0xe   : > { %684 = vmatprep.subr.bf16.mxu0 %v683_v13  ;;  %v703_v48 = vpack.c.bf16 %v556_v47, %v555_v46  ;;  %s869_s23 = smov (!%p167_p4, %s534_s23), 3  ;;  %v560_v55 = vld [vmem:[%s866_s2] ss:$0 sm:$0xff] }
   0xf   : > { %s711_s4 = smul.u32 24, %s162_s26  ;;  %666 = vmatpush3.bf16.msra.mxu1 %v663_v14  ;;  %s535_s26 = sshll.u32 %s869_s23, 3 }
  0x10   : > { %668 = vmatprep.subr.bf16.mxu1 %v667_v22  ;;  %s170_s29 = scalar_lea.vmem %s867_s3, %s535_s26 }
  0x11   : > { %s165_s19 = scalar_lea.vmem %s864_s0, %s711_s4  ;;  %686 = vmatpush3.bf16.msra.mxu0 %v683_v13 }
  0x12   : > { %v172_v19 = vld [vmem:[%s165_s19] sm:$0xff]  ;;  %v173_v21 = vld [vmem:[%s165_s19 + $0x8] sm:$0xff]  ;;  %688 = vmatprep.subr.bf16.mxu0 %v687_v23  ;;  %v174_v30 = vld [vmem:[%s165_s19 + $0x10] sm:$0x3] }
  0x13   : > { %v198_v20 = vrot.slane %v172_v19, 1  ;;  %635 = vmatprep.mubr.msk.f32.mxu0 %vm203_vm0, %v172_v19  ;;  %v199_v26 = vrot.slane %v173_v21, 1  ;;  %v373_v33 = vrot.slane %v172_v19, 2  ;;  %v374_v34 = vrot.slane %v173_v21, 2  ;;  %670 = vmatpush3.bf16.msra.mxu1 %v667_v22 }
  0x14   : > { %672 = vmatprep.subr.bf16.mxu1 %v671_v28  ;;  %v201_v37 = vrot.slane %v174_v30, 1  ;;  %v376_v49 = vrot.slane %v174_v30, 2 }
  0x15   : > { %v200_v27 = vsel %vm197_vm1, %v198_v20, %v199_v26  ;;  %690 = vmatpush3.bf16.msra.mxu0 %v687_v23  ;;  %v375_v41 = vsel %vm372_vm2, %v373_v33, %v374_v34 }
  0x16   : > { %614 = vmatprep.mubr.msk.f32.mxu1 %vm203_vm0, %v200_v27  ;;  %633 = vmatprep.subr.mxu0 %v183_v29  ;;  %v202_v44 = vsel %vm197_vm1, %v199_v26, %v201_v37  ;;  %v377_v51 = vsel %vm372_vm2, %v374_v34, %v376_v49 }
  0x17   : > { %674 = vmatpush3.bf16.msra.mxu1 %v671_v28 }
  0x18   : > { %612 = vmatprep.subr.mxu1 %v544_v39 }
  0x19   : > { %634 = vmatpush3.msra.mxu0 %v183_v29 }
  0x1a   : > { %692 = vmatprep.subr.bf16.mxu0 %v691_v38  ;;  %636 = vmatmul.mubr.msk.f32.vlgmr.msra.gmra.mrb[0].mxu0 %vm203_vm0, %v173_v21 }
  0x1b   : > { %694 = vmatpush3.bf16.msra.mxu0 %v691_v38  ;;  %656 = vmatprep.mubr.msk.f32.mxu0 %vm203_vm0, %v375_v41 }
  0x1c   : > { %696 = vmatprep.subr.bf16.mxu0 %v695_v40  ;;  %613 = vmatpush3.msra.mxu1 %v544_v39 }
  0x1d   : > { %615 = vmatmul.mubr.msk.f32.vlgmr.msra.gmra.mrb[0].mxu1 %vm203_vm0, %v202_v44 }
  0x1f   : > { %698 = vmatpush3.bf16.msra.mxu0 %v695_v40 }
  0x20   : > { %700 = vmatprep.subr.bf16.mxu0 %v699_v45 }
  0x23   : > { %702 = vmatpush3.bf16.msra.mxu0 %v699_v45 }
  0x24   : > { %704 = vmatprep.subr.bf16.mxu0 %v703_v48 }
  0x27   : > { %706 = vmatpush3.bf16.msra.mxu0 %v703_v48 }
  0x28   : > { %654 = vmatprep.subr.mxu0 %v557_v50 }
  0x2b   : > { %655 = vmatpush3.msra.mxu0 %v557_v50 }
  0x2c   : > { %657 = vmatmul.mubr.msk.f32.vlgmr.msra.gmra.mrb[0].mxu0 %vm203_vm0, %v377_v51 }
  0xf0   : > { %v616_v52 = vpop.f32.mrb[0].mxu1 }
  0xf1   : > { %v274_v53 = vpop.f32.mrb[1].mxu1 }
  0xff   : > { %v658_v54 = vpop.f32.mrb[0].mxu0 }
 0x100   : > { %v707_v56 = vadd.f32 %v658_v54, %v616_v52  ;;  %v448_v57 = vpop.f32.mrb[1].mxu0 }
 0x101   : > { %v708_v58 = vadd.f32 %v448_v57, %v274_v53 }
 0x102   : > { %v467_v59 = vadd.f32 %v707_v56, %v560_v55 }
 0x103   : > { %v466_v60 = vadd.f32 %v708_v58, %v560_v55 }
 0x104   : > { %v469_v62 = vmax.f32 %v467_v59, 0.0 }
 0x105   : > { %v468_v61 = vmax.f32 %v466_v60, 0.0 }
 0x106   : > { %471 = vst [vmem:[%s170_s29 + $0x8] sm:$0xff] %v469_v62 }
 0x107   : > { %470 = vst [vmem:[%s170_s29] sm:$0xff] %v468_v61 }
 0x108 PF: > { %s13_s12 = sadd.s32 1, %s726_s12  }
 0x109   : > { %p10_p5 = scmp.ge.s32.totalorder %s13_s12, 4  }
 0x10b   :  { %12 = sbr.rel (!%p10_p5) target bundleno = 1 (0x1), region = 64 }

</bundles_post_ra>
